<compile_context>
chip_gen: v5e
topology: v5e:2x2
jax: 0.10.0
libtpu: 0.0.40
codegen_flags: <defaults>
</compile_context>

<pallas_src>
import numpy as np
import jax
import jax.numpy as jnp
from jax.experimental import pallas as pl
from jax.experimental.pallas import tpu as pltpu


def _round_up(x, m):
    return ((x + m - 1) // m) * m


def _same_label_loss_kernel(a_ref, z_ref, w_ref, out_ref):
    """a_ref:   (TM, D) anchor rows Z[labels[j]]         (padded rows are zeros)
       z_ref:   (TM, D) rows Z[j]                        (padded rows are zeros)
       w_ref:   (TM, 1) pair weights c_{labels[j]} - 1   (padded rows are zeros)
       out_ref: (8, 128) lane-dense per-tile partial sum (scalar broadcast)
    """
    diff = a_ref[...] - z_ref[...]                 # (TM, D)  VPU
    wsq = w_ref[...] * (diff * diff)               # (TM, D)  VPU (lane-broadcast w)
    col = jnp.sum(wsq, axis=0, keepdims=True)      # (1, D)   sublane reduce
    tot = jnp.sum(col, axis=1, keepdims=True)      # (1, 1)   single cross-lane reduce
    out_ref[...] = jnp.broadcast_to(tot, (8, 128)).astype(out_ref.dtype)


def same_label_loss(Z, labels, *, row_tile=512, xla_fast_path_max_elems=0):
    """Z: (B, D) float32; labels: (B,) int. Label values must be valid row indices of
    Z (the torch reference indexes Z[label])."""
    Z = Z.astype(jnp.float32)
    B, D = Z.shape
    labels = jnp.asarray(labels).astype(jnp.int32)

    # --- tiny, exact XLA glue -------------------------------------------------
    # per-label counts -> per-row pair weight w_j = c_{labels[j]} - 1 (integer-exact)
    counts_per_label = jnp.zeros((B,), jnp.int32).at[labels].add(1)
    w_int = counts_per_label[labels] - 1                      # (B,), >= 0
    n_pairs = jnp.sum(w_int)                                   # exact pair count
    w = w_int.astype(jnp.float32)
    A = Z[labels]                                              # anchor gather (B, D)
    denom = n_pairs.astype(jnp.float32) * jnp.float32(D)

    # Optional tiny-problem fast path (kernel-launch overhead dominates); disabled
    # by default so the Pallas path is exercised.
    if xla_fast_path_max_elems and B * D <= xla_fast_path_max_elems:
        diff = A - Z
        loss_sum = jnp.sum(w[:, None] * diff * diff)
        return jnp.where(n_pairs > 0, loss_sum / denom, jnp.float32(0.0))

    # --- tiling ---------------------------------------------------------------
    # Memory-bound: use the biggest row tile that keeps double-buffered A/Z tiles
    # within ~24 MiB (fits v5e/v6e scoped defaults and v7x's 64 MiB VMEM).
    max_tm = max(8, (((24 << 20) // (16 * D)) // 8) * 8)
    TM = min(row_tile, max_tm, _round_up(B, 8))
    TM = _round_up(TM, 8)
    Bp = _round_up(B, TM)
    pad = Bp - B
    if pad:
        zpad = jnp.zeros((pad, D), Z.dtype)
        A = jnp.concatenate([A, zpad], axis=0)
        Zp = jnp.concatenate([Z, zpad], axis=0)
        w_col = jnp.concatenate([w, jnp.zeros((pad,), jnp.float32)])[:, None]
    else:
        Zp = Z
        w_col = w[:, None]

    num_tiles = Bp // TM
    # Double-buffered per-step blocks + headroom.
    need = 2 * (2 * TM * D + TM + 8 * 128) * 4
    vmem_limit = int(max(need + need // 2 + (2 << 20), 16 << 20))

    partials = pl.pallas_call(
        _same_label_loss_kernel,
        out_shape=jax.ShapeDtypeStruct((num_tiles * 8, 128), jnp.float32),
        grid=(num_tiles,),
        in_specs=[
            pl.BlockSpec((TM, D), lambda i: (i, 0)),   # anchors A (tiled, pipelined)
            pl.BlockSpec((TM, D), lambda i: (i, 0)),   # Z rows   (tiled, pipelined)
            pl.BlockSpec((TM, 1), lambda i: (i, 0)),   # pair weights
        ],
        out_specs=pl.BlockSpec((8, 128), lambda i: (i, 0)),
        compiler_params=pltpu.CompilerParams(
            dimension_semantics=("parallel",),
            vmem_limit_bytes=vmem_limit),
    )(A, Zp, w_col)

    loss_sum = jnp.sum(partials[::8, 0])   # one scalar per tile (lane 0, sublane 0)
    return jnp.where(n_pairs > 0, loss_sum / denom, jnp.float32(0.0))


def _reference_loss(Z_np, labels_np):
    losses = []
    for i, l in enumerate(labels_np):
        idx = np.where(labels_np == l)[0]
        anchor = Z_np[l, :]
        for ind in idx:
            if ind == i:
                continue
            losses.append(np.mean((anchor - Z_np[ind, :]) ** 2))
    return float(np.mean(np.stack(losses)))


if __name__ == "__main__":
    key = jax.random.PRNGKey(0)
    B, D = 8, 512                                   # module spec: Z is (B, 512)
    Z = jax.random.normal(key, (B, D), dtype=jnp.float32)
    # labels must be valid row indices into Z (the torch code indexes Z[l]);
    # include duplicates so that same-label pairs exist.
    labels_np = np.array([0, 1, 0, 2, 1, 0, 2, 3], dtype=np.int32)
    labels = jnp.asarray(labels_np)

    loss = jax.block_until_ready(same_label_loss(Z, labels))

    ref = _reference_loss(np.asarray(Z), labels_np)
    np.testing.assert_allclose(np.asarray(loss), ref, rtol=1e-4, atol=1e-6)

    print("KERNEL_OK")
</pallas_src>

<mosaic_0001>
module attributes {stable_mosaic.version = 11 : i64} {
  func.func @_same_label_loss_kernel(%arg0: i32, %arg1: memref<8x512xf32, #tpu.memory_space<vmem>>, %arg2: memref<8x512xf32, #tpu.memory_space<vmem>>, %arg3: memref<8x1xf32, #tpu.memory_space<vmem>>, %arg4: memref<8x128xf32, #tpu.memory_space<vmem>>) attributes {dimension_semantics = [#tpu.dimension_semantics<parallel>], iteration_bounds = array<i64: 1>, scalar_prefetch = 0 : i64, scratch_operands = 0 : i64, tpu.core_type = #tpu.core_type<tc>, window_params = [{transform_indices = @transform_0, window_bounds = array<i64: 8, 512>}, {transform_indices = @transform_1, window_bounds = array<i64: 8, 512>}, {transform_indices = @transform_2, window_bounds = array<i64: 8, 1>}, {transform_indices = @transform_3, window_bounds = array<i64: 8, 128>}]} {
    %c0 = arith.constant 0 : index
    %c0_0 = arith.constant 0 : index
    %0 = vector.load %arg1[%c0, %c0_0] : memref<8x512xf32, #tpu.memory_space<vmem>>, vector<8x512xf32>
    %c0_1 = arith.constant 0 : index
    %c0_2 = arith.constant 0 : index
    %1 = vector.load %arg2[%c0_1, %c0_2] : memref<8x512xf32, #tpu.memory_space<vmem>>, vector<8x512xf32>
    %2 = arith.subf %0, %1 : vector<8x512xf32>
    %c0_3 = arith.constant 0 : index
    %c0_4 = arith.constant 0 : index
    %3 = vector.load %arg3[%c0_3, %c0_4] : memref<8x1xf32, #tpu.memory_space<vmem>>, vector<8x1xf32>
    %4 = arith.mulf %2, %2 : vector<8x512xf32>
    %5 = vector.broadcast %3 : vector<8x1xf32> to vector<8x512xf32>
    %6 = arith.mulf %5, %4 : vector<8x512xf32>
    %cst = arith.constant dense<0.000000e+00> : vector<512xf32>
    %7 = vector.multi_reduction <add>, %6, %cst [0] : vector<8x512xf32> to vector<512xf32>
    %8 = vector.shape_cast %7 : vector<512xf32> to vector<1x512xf32>
    %cst_5 = arith.constant dense<0.000000e+00> : vector<1xf32>
    %9 = vector.multi_reduction <add>, %8, %cst_5 [1] : vector<1x512xf32> to vector<1xf32>
    %10 = vector.shape_cast %9 : vector<1xf32> to vector<1x1xf32>
    %11 = vector.shape_cast %10 : vector<1x1xf32> to vector<1x1xf32>
    %12 = vector.broadcast %11 : vector<1x1xf32> to vector<8x128xf32>
    %c0_6 = arith.constant 0 : index
    %c0_7 = arith.constant 0 : index
    %13 = vector.load %arg4[%c0_6, %c0_7] : memref<8x128xf32, #tpu.memory_space<vmem>>, vector<8x128xf32>
    tpu.vector_store %arg4[%c0_6, %c0_7], %12 {strides = array<i32>} : memref<8x128xf32, #tpu.memory_space<vmem>>, vector<8x128xf32>,
    return
  }
  func.func @transform_0(%arg0: i32) -> (i32, i32) {
    %c0_i32 = arith.constant 0 : i32
    %c0_i32_0 = arith.constant 0 : i32
    return %arg0, %c0_i32 : i32, i32
  }
  func.func @transform_1(%arg0: i32) -> (i32, i32) {
    %c0_i32 = arith.constant 0 : i32
    %c0_i32_0 = arith.constant 0 : i32
    return %arg0, %c0_i32 : i32, i32
  }
  func.func @transform_2(%arg0: i32) -> (i32, i32) {
    %c0_i32 = arith.constant 0 : i32
    %c0_i32_0 = arith.constant 0 : i32
    return %arg0, %c0_i32 : i32, i32
  }
  func.func @transform_3(%arg0: i32) -> (i32, i32) {
    %c0_i32 = arith.constant 0 : i32
    %c0_i32_0 = arith.constant 0 : i32
    return %arg0, %c0_i32 : i32, i32
  }
}

</mosaic_0001>

<bundles_post_ra>
// kernel: tpu_custom_call.1
= control target key start
LH: loop header
LB: loop body
LE: loop exit
PB: predicated region body
PF: predicated region fallthrough
CT: control target
= control target key end

     0   :  { %8 = vsyncpa [#allocation3], 0  ;;  %s236_s0 = inlined_call_operand.hbm [shape: f32[8,512], index: 0, kind: input, shape index: {}]   ;;  %s237_s1 = inlined_call_operand.hbm [shape: f32[8,512], index: 1, kind: input, shape index: {}]   ;;  %s238_s2 = inlined_call_operand.vmem [shape: f32[8,1], index: 2, kind: input, shape index: {}]   ;;  %s239_s3 = inlined_call_operand.hbm [shape: f32[8,128], index: 3, kind: output, shape index: {}]  }
   0x1   :  { %9 = vsyncpa [#allocation6], 0 }
   0x2   :  { %10 = vsyncpa [#allocation4], 0  ;;  %s16_s14 = sshll.u32 %s236_s0, 4  ;;  %s200_s15 = smov [#allocation2]   ;;  %s17_s14 = int_to_ptr.hbm [resolvable:$true] %s16_s14 }
   0x3   :  { %s18_s16 = sshll.u32 %s200_s15, 4  ;;  %s27_s19 = sshll.u32 %s237_s1, 4  ;;  %s19_s16 = int_to_ptr.vmem [resolvable:$true] %s18_s16  ;;  %s28_s19 = int_to_ptr.hbm [resolvable:$true] %s27_s19 }
   0x4   :  { %21 = dma.hbm_to_vmem [thread:$0]  %s17_s14, 512, %s19_s16, [#allocation3]  }
   0x5   :  { %s201_s20 = smov [#allocation5]  }
   0x6   :  { %s29_s21 = sshll.u32 %s201_s20, 4  ;;  %s30_s21 = int_to_ptr.vmem [resolvable:$true] %s29_s21 }
   0x7   :  { %32 = dma.hbm_to_vmem [thread:$0]  %s28_s19, 512, %s30_s21, [#allocation6]  }
   0x8   :  { %194 = dma.done.wait [#allocation3], 512  }
   0x9   :  { %195 = vsyncadd [#allocation3], 4294966784 }
   0xa   :  { %196 = dma.done.wait [#allocation6], 512  }
   0xb   :  { %197 = vsyncadd [#allocation6], 4294966784  ;;  %v202_v0 = vmov 0   ;;  %v55_v1 = vld [vmem:[%s238_s2] sm:$0xff]  ;;  %v44_v3 = vld [vmem:[#allocation2 + $0x8] sm:$0xff]  ;;  %s203_s1 = smov [#allocation7]  }
   0xc   :  { %121 = vset.pattern.permute.xlu0 %v202_v0  ;;  %v43_v2 = vld [vmem:[#allocation2] sm:$0xff]  ;;  %v45_v4 = vld [vmem:[#allocation2 + $0x10] sm:$0xff]  ;;  %v46_v5 = vld [vmem:[#allocation2 + $0x18] sm:$0xff]  ;;  %s104_s2 = sshll.u32 %s203_s1, 4  ;;  %s106_s25 = sshll.u32 %s239_s3, 4  ;;  %s105_s2 = int_to_ptr.vmem [resolvable:$true] %s104_s2  ;;  %s107_s25 = int_to_ptr.hbm [resolvable:$true] %s106_s25 }
   0xd   :  { %62 = vperm.xlu0 %121, %v55_v1   ;;  %v47_v6 = vld [vmem:[#allocation5] sm:$0xff]  ;;  %v48_v7 = vld [vmem:[#allocation5 + $0x8] sm:$0xff]  ;;  %v49_v8 = vld [vmem:[#allocation5 + $0x10] sm:$0xff] }
   0xe   :  { %v50_v9 = vld [vmem:[#allocation5 + $0x18] sm:$0xff]  ;;  %v51_v10 = vsub.f32 %v43_v2, %v47_v6  ;;  %v52_v11 = vsub.f32 %v44_v3, %v48_v7  ;;  %v53_v12 = vsub.f32 %v45_v4, %v49_v8 }
   0xf   :  { %v54_v13 = vsub.f32 %v46_v5, %v50_v9 }
  0x10   :  { %v56_v14 = vmul.f32 %v51_v10, %v51_v10  ;;  %v57_v15 = vmul.f32 %v52_v11, %v52_v11  ;;  %v58_v16 = vmul.f32 %v53_v12, %v53_v12 }
  0x11   :  { %v59_v17 = vmul.f32 %v54_v13, %v54_v13 }
  0x7f   :  { %v63_v18 = vpop.permute.xlu0 %62 }
  0x80   :  { %v65_v19 = vmul.f32 %v63_v18, %v56_v14  ;;  %v66_v20 = vmul.f32 %v63_v18, %v57_v15  ;;  %v67_v21 = vmul.f32 %v63_v18, %v58_v16  ;;  %v68_v22 = vmul.f32 %v63_v18, %v59_v17 }
  0x82   :  { %v69_v23 = vrot.slane %v65_v19, 4  ;;  %v75_v24 = vrot.slane %v66_v20, 4  ;;  %v81_v25 = vrot.slane %v67_v21, 4  ;;  %v87_v26 = vrot.slane %v68_v22, 4 }
  0x84   :  { %v70_v27 = vadd.f32 %v69_v23, %v65_v19  ;;  %v76_v28 = vadd.f32 %v75_v24, %v66_v20  ;;  %v82_v29 = vadd.f32 %v81_v25, %v67_v21  ;;  %v88_v30 = vadd.f32 %v87_v26, %v68_v22 }
  0x86   :  { %v71_v31 = vrot.slane %v70_v27, 2  ;;  %v77_v32 = vrot.slane %v76_v28, 2  ;;  %v83_v33 = vrot.slane %v82_v29, 2  ;;  %v89_v34 = vrot.slane %v88_v30, 2 }
  0x88   :  { %v72_v35 = vadd.f32 %v71_v31, %v70_v27  ;;  %v78_v36 = vadd.f32 %v77_v32, %v76_v28  ;;  %v84_v37 = vadd.f32 %v83_v33, %v82_v29  ;;  %v90_v38 = vadd.f32 %v89_v34, %v88_v30 }
  0x8a   :  { %v73_v39 = vrot.slane %v72_v35, 1  ;;  %v79_v40 = vrot.slane %v78_v36, 1  ;;  %v85_v41 = vrot.slane %v84_v37, 1  ;;  %v91_v44 = vrot.slane %v90_v38, 1 }
  0x8c   :  { %v74_v42 = vadd.f32 %v73_v39, %v72_v35  ;;  %v80_v43 = vadd.f32 %v79_v40, %v78_v36  ;;  %v86_v45 = vadd.f32 %v85_v41, %v84_v37  ;;  %v92_v47 = vadd.f32 %v91_v44, %v90_v38 }
  0x8e   :  { %v93_v46 = vadd.f32 %v80_v43, %v74_v42 }
  0x90   :  { %v94_v48 = vadd.f32 %v93_v46, %v86_v45 }
  0x92   :  { %v95_v49 = vadd.f32 %v94_v48, %v92_v47 }
  0x94   :  { %96 = vadd.xlane.f32.xlu0 %v95_v49 }
 0x107   :  { %v97_v50 = vpop.xlane.xlu0 %96 }
 0x108   :  { %98 = vst [vmem:[#allocation7] sm:$0xff] %v97_v50 }
 0x109   :  { %109 = dma.vmem_to_hbm [thread:$0]  %s105_s2, 128, %s107_s25, [#allocation4]  }
 0x10a   :  { %198 = dma.done.wait [#allocation4], 128  }
 0x10b   :  { %199 = vsyncadd [#allocation4], 4294967168 }
 0x10c   :  { %114 = vsyncpa [#allocation3], 1 }
 0x10d   :  { %115 = vsyncpa [#allocation6], 1 }
 0x10e   :  { %116 = vsyncpa [#allocation4], 1 }

</bundles_post_ra>
